<compile_context>
chip_gen: v6e
topology: v6e:2x2x1
jax: 0.10.0
libtpu: 0.0.40
codegen_flags: <defaults>
</compile_context>

<pallas_src>
import functools
import math

import jax
import jax.numpy as jnp
from jax import lax
from jax.experimental import pallas as pl
from jax.experimental.pallas import tpu as pltpu


# ----------------------------------------------------------------------------
# Bilinear (align_corners=False) coefficients — identical math to PyTorch's
# upsample_bilinear2d source-index computation.
# ----------------------------------------------------------------------------
def _bilinear_coeffs(in_size: int, out_size: int):
    scale = in_size / out_size
    idx0, idx1, lam = [], [], []
    for o in range(out_size):
        src = (o + 0.5) * scale - 0.5
        if src < 0.0:
            src = 0.0
        i0 = min(int(math.floor(src)), in_size - 1)
        i1 = min(i0 + 1, in_size - 1)
        idx0.append(i0)
        idx1.append(i1)
        lam.append(src - i0)
    return idx0, idx1, lam


def _bilinear_matrix(in_size: int, out_size: int) -> jnp.ndarray:
    idx0, idx1, lam = _bilinear_coeffs(in_size, out_size)
    m = [[0.0] * in_size for _ in range(out_size)]
    for o in range(out_size):
        m[o][idx0[o]] += 1.0 - lam[o]
        m[o][idx1[o]] += lam[o]
    return jnp.array(m, dtype=jnp.float32)


# ----------------------------------------------------------------------------
# Fused per-hook kernel: conv3x3 + bias -> conv3x3 -> joint bilinear upsample
# (+ bias). Channels-first, flattened spatial on the lane axis.
# One grid step == one batch element.
# ----------------------------------------------------------------------------
def _hook_kernel(x_ref, w1_ref, b1_ref, w2_ref, b2_ref, mask_ref, mbig_ref,
                 o_ref,                      # output (Cm, Ho*Wo)
                 y1p_ref,                    # scratch: padded conv1 output
                 *, Wi, M1, Cm):
    Wp = Wi + 2                              # padded row width in the flat layout

    # ---- conv1: 9 per-tap whole-image matmuls over the flat padded image ----
    acc1 = jnp.zeros((Cm, M1), jnp.float32)
    for t in range(9):
        dy, dx = t // 3, t % 3
        off = dy * Wp + dx
        acc1 = acc1 + jnp.dot(w1_ref[t], x_ref[:, off:off + M1],
                              preferred_element_type=jnp.float32)

    # Add bias once; zero the wrap-around junk columns; write into the interior
    # of the (re)zeroed padded scratch so conv2 gets its padding=1 zeros.
    y1p_ref[...] = jnp.zeros_like(y1p_ref)
    y1p_ref[:, Wi + 3:Wi + 3 + M1] = (acc1 + b1_ref[...]) * mask_ref[...]

    # ---- conv2: same structure (bias folded in after the upsample) ----------
    acc2 = jnp.zeros((Cm, M1), jnp.float32)
    for t in range(9):
        dy, dx = t // 3, t % 3
        off = dy * Wp + dx
        acc2 = acc2 + jnp.dot(w2_ref[t], y1p_ref[:, off:off + M1],
                              preferred_element_type=jnp.float32)

    # ---- joint H+W bilinear upsample as one lane-dense matmul ---------------
    up = jnp.dot(acc2, mbig_ref[...], preferred_element_type=jnp.float32)
    o_ref[...] = (up + b2_ref[...]).astype(o_ref.dtype)


def hcolumn_branch(stored_nchw, w1, b1, w2, b2, out_hw):
    """One hook branch: two 3x3 convs + bilinear upsample to out_hw (NCHW in/out)."""
    N, Cin, Hi, Wi = stored_nchw.shape
    Cm = w1.shape[-1]
    Ho, Wo = out_hw
    Wp = Wi + 2
    M1 = Hi * Wp                 # conv output length in padded-width flat layout
    Lp = (Hi + 3) * Wp           # flat padded input length (+1 slack row)

    # Zero-pad (pad=1 for conv1, +1 slack row for the tap-shifted flat reads)
    # and flatten H,W onto one lane axis. Stays channels-first: no transposes.
    xpf = jnp.pad(stored_nchw.astype(jnp.float32),
                  ((0, 0), (0, 0), (1, 2), (1, 1))).reshape(N, Cin, Lp)

    # Weights as (tap, Cout, Cin) so each tap is a (Cm, Cin) @ (Cin, M1) matmul.
    w1k = jnp.transpose(w1.astype(jnp.float32).reshape(9, Cin, Cm), (0, 2, 1))
    w2k = jnp.transpose(w2.astype(jnp.float32).reshape(9, Cm, Cm), (0, 2, 1))
    b1k = b1.astype(jnp.float32).reshape(Cm, 1)
    b2k = b2.astype(jnp.float32).reshape(Cm, 1)

    # Mask of valid (non wrap-around) columns in the padded-width flat layout.
    col = jnp.arange(M1) % Wp
    mask = (col < Wi).astype(jnp.float32).reshape(1, M1)

    # Joint bilinear (align_corners=False) interpolation matrix:
    #   MBIG[h*Wp + w, ho*Wo + wo] = MH[ho, h] * MW[wo, w]   (0 for junk cols).
    mh = _bilinear_matrix(Hi, Ho)                       # (Ho, Hi)
    mw = _bilinear_matrix(Wi, Wo)                       # (Wo, Wi)
    mbig = jnp.einsum("oh,pw->hwop", mh, mw)            # (Hi, Wi, Ho, Wo)
    mbig = jnp.pad(mbig, ((0, 0), (0, 2), (0, 0), (0, 0)))
    mbig = mbig.reshape(M1, Ho * Wo)

    kern = functools.partial(_hook_kernel, Wi=Wi, M1=M1, Cm=Cm)

    out = pl.pallas_call(
        kern,
        out_shape=jax.ShapeDtypeStruct((N, Cm, Ho * Wo), jnp.float32),
        grid=(N,),
        in_specs=[
            pl.BlockSpec((None, Cin, Lp), lambda b: (b, 0, 0)),     # activations
            pl.BlockSpec((9, Cm, Cin), lambda b: (0, 0, 0)),        # conv1 weights
            pl.BlockSpec((Cm, 1), lambda b: (0, 0)),                # conv1 bias
            pl.BlockSpec((9, Cm, Cm), lambda b: (0, 0, 0)),         # conv2 weights
            pl.BlockSpec((Cm, 1), lambda b: (0, 0)),                # conv2 bias
            pl.BlockSpec((1, M1), lambda b: (0, 0)),                # valid-col mask
            pl.BlockSpec((M1, Ho * Wo), lambda b: (0, 0)),          # upsample matrix
        ],
        out_specs=pl.BlockSpec((None, Cm, Ho * Wo), lambda b: (b, 0, 0)),
        scratch_shapes=[
            pltpu.VMEM((Cm, Lp), jnp.float32),   # zero-padded conv1 output (flat)
        ],
        compiler_params=pltpu.CompilerParams(
            dimension_semantics=("parallel",),
            vmem_limit_bytes=32 * 1024 * 1024),
    )(xpf, w1k, b1k, w2k, b2k, mask, mbig)

    return out.reshape(N, Cm, Ho, Wo)            # free row-major reshape (NCHW)


def hcolumns_forward(x_nchw, stored_list, params):
    """Pallas implementation of Hcolumns.forward (with factorization)."""
    # TODO(synk): PyTorch `Hook` capture machinery has no kernel equivalent;
    # the hooked activations are passed in explicitly as `stored_list`.
    N, Cx, H, W = x_nchw.shape
    outs = []
    for i in range(len(stored_list)):
        w1, b1, w2, b2 = params[i]
        outs.append(hcolumn_branch(stored_list[i], w1, b1, w2, b2, (H, W)))
    outs.append(x_nchw)
    return jnp.concatenate(outs, axis=1)


# ----------------------------------------------------------------------------
# Pure-JAX reference (independent path: lax.conv + interpolation matrices).
# ----------------------------------------------------------------------------
def ref_forward(x_nchw, stored_list, params):
    N, Cx, H, W = x_nchw.shape
    dn = ("NHWC", "HWIO", "NHWC")
    outs = []
    for i, s in enumerate(stored_list):
        w1, b1, w2, b2 = params[i]
        xs = jnp.transpose(s, (0, 2, 3, 1))
        y = lax.conv_general_dilated(xs, w1, (1, 1), "SAME",
                                     dimension_numbers=dn) + b1
        y = lax.conv_general_dilated(y, w2, (1, 1), "SAME",
                                     dimension_numbers=dn) + b2
        Hi, Wi = s.shape[2], s.shape[3]
        mh = _bilinear_matrix(Hi, H)
        mw = _bilinear_matrix(Wi, W)
        y = jnp.einsum("oh,nhwc->nowc", mh, y)
        y = jnp.einsum("pw,nowc->nopc", mw, y)
        outs.append(jnp.transpose(y, (0, 3, 1, 2)))
    outs.append(x_nchw)
    return jnp.concatenate(outs, axis=1)


if __name__ == "__main__":
    key = jax.random.PRNGKey(0)
    n = 2                      # number of hooks
    nc = [8, 6, 4]             # hook channel counts; nc[-1] == channels of x
    N, H, W = 2, 16, 16
    Cx = nc[-1]

    keys = jax.random.split(key, 16)
    x = jax.random.normal(keys[0], (N, Cx, H, W), dtype=jnp.float32)

    stored, params = [], []
    k = 1
    for i in range(n):
        s_hw = H // (2 ** (n - i))           # hook i spatial size
        stored.append(jax.random.normal(keys[k], (N, nc[i], s_hw, s_hw),
                                        dtype=jnp.float32)); k += 1
        w1 = 0.1 * jax.random.normal(keys[k], (3, 3, nc[i], nc[-1]),
                                     dtype=jnp.float32); k += 1
        b1 = 0.1 * jax.random.normal(keys[k], (nc[-1],), dtype=jnp.float32); k += 1
        w2 = 0.1 * jax.random.normal(keys[k], (3, 3, nc[-1], nc[-1]),
                                     dtype=jnp.float32); k += 1
        b2 = 0.1 * jax.random.normal(keys[k], (nc[-1],), dtype=jnp.float32); k += 1
        params.append((w1, b1, w2, b2))

    out = hcolumns_forward(x, stored, params)
    out = jax.block_until_ready(out)

    assert out.shape == (N, nc[-1] * n + Cx, H, W), out.shape
    ref = ref_forward(x, stored, params)
    err = float(jnp.max(jnp.abs(out - ref)))
    assert err < 1e-4, f"max abs err {err}"

    print("KERNEL_OK")
</pallas_src>

<mosaic_0001>
module attributes {stable_mosaic.version = 11 : i64} {
  func.func @_hook_kernel(%arg0: i32, %arg1: memref<1x8x42xf32, #tpu.memory_space<vmem>>, %arg2: memref<9x4x8xf32, #tpu.memory_space<vmem>>, %arg3: memref<4x1xf32, #tpu.memory_space<vmem>>, %arg4: memref<9x4x4xf32, #tpu.memory_space<vmem>>, %arg5: memref<4x1xf32, #tpu.memory_space<vmem>>, %arg6: memref<1x24xf32, #tpu.memory_space<vmem>>, %arg7: memref<24x256xf32, #tpu.memory_space<vmem>>, %arg8: memref<1x4x256xf32, #tpu.memory_space<vmem>>, %arg9: memref<4x42xf32, #tpu.memory_space<vmem>>) attributes {dimension_semantics = [#tpu.dimension_semantics<parallel>], iteration_bounds = array<i64: 2>, scalar_prefetch = 0 : i64, scratch_operands = 1 : i64, tpu.core_type = #tpu.core_type<tc>, window_params = [{transform_indices = @transform_0, window_bounds = array<i64: 1, 8, 42>}, {pipeline_mode = #tpu.pipeline_mode<synchronous>, transform_indices = @transform_1, window_bounds = array<i64: 9, 4, 8>}, {pipeline_mode = #tpu.pipeline_mode<synchronous>, transform_indices = @transform_2, window_bounds = array<i64: 4, 1>}, {pipeline_mode = #tpu.pipeline_mode<synchronous>, transform_indices = @transform_3, window_bounds = array<i64: 9, 4, 4>}, {pipeline_mode = #tpu.pipeline_mode<synchronous>, transform_indices = @transform_4, window_bounds = array<i64: 4, 1>}, {pipeline_mode = #tpu.pipeline_mode<synchronous>, transform_indices = @transform_5, window_bounds = array<i64: 1, 24>}, {pipeline_mode = #tpu.pipeline_mode<synchronous>, transform_indices = @transform_6, window_bounds = array<i64: 24, 256>}, {transform_indices = @transform_7, window_bounds = array<i64: 1, 4, 256>}]} {
    %cst = arith.constant 0.000000e+00 : f32
    %0 = vector.broadcast %cst : f32 to vector<4x24xf32>
    %c0 = arith.constant 0 : index
    %c0_0 = arith.constant 0 : index
    %c0_1 = arith.constant 0 : index
    %1 = vector.load %arg2[%c0, %c0_0, %c0_1] : memref<9x4x8xf32, #tpu.memory_space<vmem>>, vector<1x4x8xf32>
    %2 = vector.shape_cast %1 : vector<1x4x8xf32> to vector<4x8xf32>
    %c0_2 = arith.constant 0 : index
    %c0_3 = arith.constant 0 : index
    %c0_4 = arith.constant 0 : index
    %3 = vector.load %arg1[%c0_2, %c0_3, %c0_4] : memref<1x8x42xf32, #tpu.memory_space<vmem>>, vector<1x8x24xf32>
    %4 = vector.shape_cast %3 : vector<1x8x24xf32> to vector<8x24xf32>
    %cst_5 = arith.constant dense<0.000000e+00> : vector<4x24xf32>
    %5 = tpu.matmul %2, %4, %cst_5 {dimension_numbers = #tpu.dot_dimension_numbers<[1], [0], [0], [1], [0, 0, 1, 1], [], []>} : vector<4x8xf32>, vector<8x24xf32>, vector<4x24xf32> -> vector<4x24xf32>
    %6 = arith.addf %0, %5 : vector<4x24xf32>
    %c1 = arith.constant 1 : index
    %c0_6 = arith.constant 0 : index
    %c0_7 = arith.constant 0 : index
    %7 = vector.load %arg2[%c1, %c0_6, %c0_7] : memref<9x4x8xf32, #tpu.memory_space<vmem>>, vector<1x4x8xf32>
    %8 = vector.shape_cast %7 : vector<1x4x8xf32> to vector<4x8xf32>
    %c0_8 = arith.constant 0 : index
    %c0_9 = arith.constant 0 : index
    %c1_10 = arith.constant 1 : index
    %9 = vector.load %arg1[%c0_8, %c0_9, %c1_10] : memref<1x8x42xf32, #tpu.memory_space<vmem>>, vector<1x8x24xf32>
    %10 = vector.shape_cast %9 : vector<1x8x24xf32> to vector<8x24xf32>
    %cst_11 = arith.constant dense<0.000000e+00> : vector<4x24xf32>
    %11 = tpu.matmul %8, %10, %cst_11 {dimension_numbers = #tpu.dot_dimension_numbers<[1], [0], [0], [1], [0, 0, 1, 1], [], []>} : vector<4x8xf32>, vector<8x24xf32>, vector<4x24xf32> -> vector<4x24xf32>
    %12 = arith.addf %6, %11 : vector<4x24xf32>
    %c2 = arith.constant 2 : index
    %c0_12 = arith.constant 0 : index
    %c0_13 = arith.constant 0 : index
    %13 = vector.load %arg2[%c2, %c0_12, %c0_13] : memref<9x4x8xf32, #tpu.memory_space<vmem>>, vector<1x4x8xf32>
    %14 = vector.shape_cast %13 : vector<1x4x8xf32> to vector<4x8xf32>
    %c0_14 = arith.constant 0 : index
    %c0_15 = arith.constant 0 : index
    %c2_16 = arith.constant 2 : index
    %15 = vector.load %arg1[%c0_14, %c0_15, %c2_16] : memref<1x8x42xf32, #tpu.memory_space<vmem>>, vector<1x8x24xf32>
    %16 = vector.shape_cast %15 : vector<1x8x24xf32> to vector<8x24xf32>
    %cst_17 = arith.constant dense<0.000000e+00> : vector<4x24xf32>
    %17 = tpu.matmul %14, %16, %cst_17 {dimension_numbers = #tpu.dot_dimension_numbers<[1], [0], [0], [1], [0, 0, 1, 1], [], []>} : vector<4x8xf32>, vector<8x24xf32>, vector<4x24xf32> -> vector<4x24xf32>
    %18 = arith.addf %12, %17 : vector<4x24xf32>
    %c3 = arith.constant 3 : index
    %c0_18 = arith.constant 0 : index
    %c0_19 = arith.constant 0 : index
    %19 = vector.load %arg2[%c3, %c0_18, %c0_19] : memref<9x4x8xf32, #tpu.memory_space<vmem>>, vector<1x4x8xf32>
    %20 = vector.shape_cast %19 : vector<1x4x8xf32> to vector<4x8xf32>
    %c0_20 = arith.constant 0 : index
    %c0_21 = arith.constant 0 : index
    %c6 = arith.constant 6 : index
    %21 = vector.load %arg1[%c0_20, %c0_21, %c6] : memref<1x8x42xf32, #tpu.memory_space<vmem>>, vector<1x8x24xf32>
    %22 = vector.shape_cast %21 : vector<1x8x24xf32> to vector<8x24xf32>
    %cst_22 = arith.constant dense<0.000000e+00> : vector<4x24xf32>
    %23 = tpu.matmul %20, %22, %cst_22 {dimension_numbers = #tpu.dot_dimension_numbers<[1], [0], [0], [1], [0, 0, 1, 1], [], []>} : vector<4x8xf32>, vector<8x24xf32>, vector<4x24xf32> -> vector<4x24xf32>
    %24 = arith.addf %18, %23 : vector<4x24xf32>
    %c4 = arith.constant 4 : index
    %c0_23 = arith.constant 0 : index
    %c0_24 = arith.constant 0 : index
    %25 = vector.load %arg2[%c4, %c0_23, %c0_24] : memref<9x4x8xf32, #tpu.memory_space<vmem>>, vector<1x4x8xf32>
    %26 = vector.shape_cast %25 : vector<1x4x8xf32> to vector<4x8xf32>
    %c0_25 = arith.constant 0 : index
    %c0_26 = arith.constant 0 : index
    %c7 = arith.constant 7 : index
    %27 = vector.load %arg1[%c0_25, %c0_26, %c7] : memref<1x8x42xf32, #tpu.memory_space<vmem>>, vector<1x8x24xf32>
    %28 = vector.shape_cast %27 : vector<1x8x24xf32> to vector<8x24xf32>
    %cst_27 = arith.constant dense<0.000000e+00> : vector<4x24xf32>
    %29 = tpu.matmul %26, %28, %cst_27 {dimension_numbers = #tpu.dot_dimension_numbers<[1], [0], [0], [1], [0, 0, 1, 1], [], []>} : vector<4x8xf32>, vector<8x24xf32>, vector<4x24xf32> -> vector<4x24xf32>
    %30 = arith.addf %24, %29 : vector<4x24xf32>
    %c5 = arith.constant 5 : index
    %c0_28 = arith.constant 0 : index
    %c0_29 = arith.constant 0 : index
    %31 = vector.load %arg2[%c5, %c0_28, %c0_29] : memref<9x4x8xf32, #tpu.memory_space<vmem>>, vector<1x4x8xf32>
    %32 = vector.shape_cast %31 : vector<1x4x8xf32> to vector<4x8xf32>
    %c0_30 = arith.constant 0 : index
    %c0_31 = arith.constant 0 : index
    %c8 = arith.constant 8 : index
    %33 = vector.load %arg1[%c0_30, %c0_31, %c8] : memref<1x8x42xf32, #tpu.memory_space<vmem>>, vector<1x8x24xf32>
    %34 = vector.shape_cast %33 : vector<1x8x24xf32> to vector<8x24xf32>
    %cst_32 = arith.constant dense<0.000000e+00> : vector<4x24xf32>
    %35 = tpu.matmul %32, %34, %cst_32 {dimension_numbers = #tpu.dot_dimension_numbers<[1], [0], [0], [1], [0, 0, 1, 1], [], []>} : vector<4x8xf32>, vector<8x24xf32>, vector<4x24xf32> -> vector<4x24xf32>
    %36 = arith.addf %30, %35 : vector<4x24xf32>
    %c6_33 = arith.constant 6 : index
    %c0_34 = arith.constant 0 : index
    %c0_35 = arith.constant 0 : index
    %37 = vector.load %arg2[%c6_33, %c0_34, %c0_35] : memref<9x4x8xf32, #tpu.memory_space<vmem>>, vector<1x4x8xf32>
    %38 = vector.shape_cast %37 : vector<1x4x8xf32> to vector<4x8xf32>
    %c0_36 = arith.constant 0 : index
    %c0_37 = arith.constant 0 : index
    %c12 = arith.constant 12 : index
    %39 = vector.load %arg1[%c0_36, %c0_37, %c12] : memref<1x8x42xf32, #tpu.memory_space<vmem>>, vector<1x8x24xf32>
    %40 = vector.shape_cast %39 : vector<1x8x24xf32> to vector<8x24xf32>
    %cst_38 = arith.constant dense<0.000000e+00> : vector<4x24xf32>
    %41 = tpu.matmul %38, %40, %cst_38 {dimension_numbers = #tpu.dot_dimension_numbers<[1], [0], [0], [1], [0, 0, 1, 1], [], []>} : vector<4x8xf32>, vector<8x24xf32>, vector<4x24xf32> -> vector<4x24xf32>
    %42 = arith.addf %36, %41 : vector<4x24xf32>
    %c7_39 = arith.constant 7 : index
    %c0_40 = arith.constant 0 : index
    %c0_41 = arith.constant 0 : index
    %43 = vector.load %arg2[%c7_39, %c0_40, %c0_41] : memref<9x4x8xf32, #tpu.memory_space<vmem>>, vector<1x4x8xf32>
    %44 = vector.shape_cast %43 : vector<1x4x8xf32> to vector<4x8xf32>
    %c0_42 = arith.constant 0 : index
    %c0_43 = arith.constant 0 : index
    %c13 = arith.constant 13 : index
    %45 = vector.load %arg1[%c0_42, %c0_43, %c13] : memref<1x8x42xf32, #tpu.memory_space<vmem>>, vector<1x8x24xf32>
    %46 = vector.shape_cast %45 : vector<1x8x24xf32> to vector<8x24xf32>
    %cst_44 = arith.constant dense<0.000000e+00> : vector<4x24xf32>
    %47 = tpu.matmul %44, %46, %cst_44 {dimension_numbers = #tpu.dot_dimension_numbers<[1], [0], [0], [1], [0, 0, 1, 1], [], []>} : vector<4x8xf32>, vector<8x24xf32>, vector<4x24xf32> -> vector<4x24xf32>
    %48 = arith.addf %42, %47 : vector<4x24xf32>
    %c8_45 = arith.constant 8 : index
    %c0_46 = arith.constant 0 : index
    %c0_47 = arith.constant 0 : index
    %49 = vector.load %arg2[%c8_45, %c0_46, %c0_47] : memref<9x4x8xf32, #tpu.memory_space<vmem>>, vector<1x4x8xf32>
    %50 = vector.shape_cast %49 : vector<1x4x8xf32> to vector<4x8xf32>
    %c0_48 = arith.constant 0 : index
    %c0_49 = arith.constant 0 : index
    %c14 = arith.constant 14 : index
    %51 = vector.load %arg1[%c0_48, %c0_49, %c14] : memref<1x8x42xf32, #tpu.memory_space<vmem>>, vector<1x8x24xf32>
    %52 = vector.shape_cast %51 : vector<1x8x24xf32> to vector<8x24xf32>
    %cst_50 = arith.constant dense<0.000000e+00> : vector<4x24xf32>
    %53 = tpu.matmul %50, %52, %cst_50 {dimension_numbers = #tpu.dot_dimension_numbers<[1], [0], [0], [1], [0, 0, 1, 1], [], []>} : vector<4x8xf32>, vector<8x24xf32>, vector<4x24xf32> -> vector<4x24xf32>
    %54 = arith.addf %48, %53 : vector<4x24xf32>
    %cst_51 = arith.constant 0.000000e+00 : f32
    %55 = vector.broadcast %cst_51 : f32 to vector<4x42xf32>
    %c0_52 = arith.constant 0 : index
    %c0_53 = arith.constant 0 : index
    %56 = vector.load %arg9[%c0_52, %c0_53] : memref<4x42xf32, #tpu.memory_space<vmem>>, vector<4x42xf32>
    tpu.vector_store %arg9[%c0_52, %c0_53], %55 {strides = array<i32>} : memref<4x42xf32, #tpu.memory_space<vmem>>, vector<4x42xf32>,
    %c0_54 = arith.constant 0 : index
    %c0_55 = arith.constant 0 : index
    %57 = vector.load %arg3[%c0_54, %c0_55] : memref<4x1xf32, #tpu.memory_space<vmem>>, vector<4x1xf32>
    %58 = vector.broadcast %57 : vector<4x1xf32> to vector<4x24xf32>
    %59 = arith.addf %54, %58 : vector<4x24xf32>
    %c0_56 = arith.constant 0 : index
    %c0_57 = arith.constant 0 : index
    %60 = vector.load %arg6[%c0_56, %c0_57] : memref<1x24xf32, #tpu.memory_space<vmem>>, vector<1x24xf32>
    %61 = vector.broadcast %60 : vector<1x24xf32> to vector<4x24xf32>
    %62 = arith.mulf %59, %61 : vector<4x24xf32>
    %c0_58 = arith.constant 0 : index
    %c7_59 = arith.constant 7 : index
    %63 = vector.load %arg9[%c0_58, %c7_59] : memref<4x42xf32, #tpu.memory_space<vmem>>, vector<4x24xf32>
    tpu.vector_store %arg9[%c0_58, %c7_59], %62 {strides = array<i32>} : memref<4x42xf32, #tpu.memory_space<vmem>>, vector<4x24xf32>,
    %cst_60 = arith.constant 0.000000e+00 : f32
    %64 = vector.broadcast %cst_60 : f32 to vector<4x24xf32>
    %c0_61 = arith.constant 0 : index
    %c0_62 = arith.constant 0 : index
    %c0_63 = arith.constant 0 : index
    %65 = vector.load %arg4[%c0_61, %c0_62, %c0_63] : memref<9x4x4xf32, #tpu.memory_space<vmem>>, vector<1x4x4xf32>
    %66 = vector.shape_cast %65 : vector<1x4x4xf32> to vector<4x4xf32>
    %c0_64 = arith.constant 0 : index
    %c0_65 = arith.constant 0 : index
    %67 = vector.load %arg9[%c0_64, %c0_65] : memref<4x42xf32, #tpu.memory_space<vmem>>, vector<4x24xf32>
    %cst_66 = arith.constant dense<0.000000e+00> : vector<4x24xf32>
    %68 = tpu.matmul %66, %67, %cst_66 {dimension_numbers = #tpu.dot_dimension_numbers<[1], [0], [0], [1], [0, 0, 1, 1], [], []>} : vector<4x4xf32>, vector<4x24xf32>, vector<4x24xf32> -> vector<4x24xf32>
    %69 = arith.addf %64, %68 : vector<4x24xf32>
    %c1_67 = arith.constant 1 : index
    %c0_68 = arith.constant 0 : index
    %c0_69 = arith.constant 0 : index
    %70 = vector.load %arg4[%c1_67, %c0_68, %c0_69] : memref<9x4x4xf32, #tpu.memory_space<vmem>>, vector<1x4x4xf32>
    %71 = vector.shape_cast %70 : vector<1x4x4xf32> to vector<4x4xf32>
    %c0_70 = arith.constant 0 : index
    %c1_71 = arith.constant 1 : index
    %72 = vector.load %arg9[%c0_70, %c1_71] : memref<4x42xf32, #tpu.memory_space<vmem>>, vector<4x24xf32>
    %cst_72 = arith.constant dense<0.000000e+00> : vector<4x24xf32>
    %73 = tpu.matmul %71, %72, %cst_72 {dimension_numbers = #tpu.dot_dimension_numbers<[1], [0], [0], [1], [0, 0, 1, 1], [], []>} : vector<4x4xf32>, vector<4x24xf32>, vector<4x24xf32> -> vector<4x24xf32>
    %74 = arith.addf %69, %73 : vector<4x24xf32>
    %c2_73 = arith.constant 2 : index
    %c0_74 = arith.constant 0 : index
    %c0_75 = arith.constant 0 : index
    %75 = vector.load %arg4[%c2_73, %c0_74, %c0_75] : memref<9x4x4xf32, #tpu.memory_space<vmem>>, vector<1x4x4xf32>
    %76 = vector.shape_cast %75 : vector<1x4x4xf32> to vector<4x4xf32>
    %c0_76 = arith.constant 0 : index
    %c2_77 = arith.constant 2 : index
    %77 = vector.load %arg9[%c0_76, %c2_77] : memref<4x42xf32, #tpu.memory_space<vmem>>, vector<4x24xf32>
    %cst_78 = arith.constant dense<0.000000e+00> : vector<4x24xf32>
    %78 = tpu.matmul %76, %77, %cst_78 {dimension_numbers = #tpu.dot_dimension_numbers<[1], [0], [0], [1], [0, 0, 1, 1], [], []>} : vector<4x4xf32>, vector<4x24xf32>, vector<4x24xf32> -> vector<4x24xf32>
    %79 = arith.addf %74, %78 : vector<4x24xf32>
    %c3_79 = arith.constant 3 : index
    %c0_80 = arith.constant 0 : index
    %c0_81 = arith.constant 0 : index
    %80 = vector.load %arg4[%c3_79, %c0_80, %c0_81] : memref<9x4x4xf32, #tpu.memory_space<vmem>>, vector<1x4x4xf32>
    %81 = vector.shape_cast %80 : vector<1x4x4xf32> to vector<4x4xf32>
    %c0_82 = arith.constant 0 : index
    %c6_83 = arith.constant 6 : index
    %82 = vector.load %arg9[%c0_82, %c6_83] : memref<4x42xf32, #tpu.memory_space<vmem>>, vector<4x24xf32>
    %cst_84 = arith.constant dense<0.000000e+00> : vector<4x24xf32>
    %83 = tpu.matmul %81, %82, %cst_84 {dimension_numbers = #tpu.dot_dimension_numbers<[1], [0], [0], [1], [0, 0, 1, 1], [], []>} : vector<4x4xf32>, vector<4x24xf32>, vector<4x24xf32> -> vector<4x24xf32>
    %84 = arith.addf %79, %83 : vector<4x24xf32>
    %c4_85 = arith.constant 4 : index
    %c0_86 = arith.constant 0 : index
    %c0_87 = arith.constant 0 : index
    %85 = vector.load %arg4[%c4_85, %c0_86, %c0_87] : memref<9x4x4xf32, #tpu.memory_space<vmem>>, vector<1x4x4xf32>
    %86 = vector.shape_cast %85 : vector<1x4x4xf32> to vector<4x4xf32>
    %c0_88 = arith.constant 0 : index
    %c7_89 = arith.constant 7 : index
    %87 = vector.load %arg9[%c0_88, %c7_89] : memref<4x42xf32, #tpu.memory_space<vmem>>, vector<4x24xf32>
    %cst_90 = arith.constant dense<0.000000e+00> : vector<4x24xf32>
    %88 = tpu.matmul %86, %87, %cst_90 {dimension_numbers = #tpu.dot_dimension_numbers<[1], [0], [0], [1], [0, 0, 1, 1], [], []>} : vector<4x4xf32>, vector<4x24xf32>, vector<4x24xf32> -> vector<4x24xf32>
    %89 = arith.addf %84, %88 : vector<4x24xf32>
    %c5_91 = arith.constant 5 : index
    %c0_92 = arith.constant 0 : index
    %c0_93 = arith.constant 0 : index
    %90 = vector.load %arg4[%c5_91, %c0_92, %c0_93] : memref<9x4x4xf32, #tpu.memory_space<vmem>>, vector<1x4x4xf32>
    %91 = vector.shape_cast %90 : vector<1x4x4xf32> to vector<4x4xf32>
    %c0_94 = arith.constant 0 : index
    %c8_95 = arith.constant 8 : index
    %92 = vector.load %arg9[%c0_94, %c8_95] : memref<4x42xf32, #tpu.memory_space<vmem>>, vector<4x24xf32>
    %cst_96 = arith.constant dense<0.000000e+00> : vector<4x24xf32>
    %93 = tpu.matmul %91, %92, %cst_96 {dimension_numbers = #tpu.dot_dimension_numbers<[1], [0], [0], [1], [0, 0, 1, 1], [], []>} : vector<4x4xf32>, vector<4x24xf32>, vector<4x24xf32> -> vector<4x24xf32>
    %94 = arith.addf %89, %93 : vector<4x24xf32>
    %c6_97 = arith.constant 6 : index
    %c0_98 = arith.constant 0 : index
    %c0_99 = arith.constant 0 : index
    %95 = vector.load %arg4[%c6_97, %c0_98, %c0_99] : memref<9x4x4xf32, #tpu.memory_space<vmem>>, vector<1x4x4xf32>
    %96 = vector.shape_cast %95 : vector<1x4x4xf32> to vector<4x4xf32>
    %c0_100 = arith.constant 0 : index
    %c12_101 = arith.constant 12 : index
    %97 = vector.load %arg9[%c0_100, %c12_101] : memref<4x42xf32, #tpu.memory_space<vmem>>, vector<4x24xf32>
    %cst_102 = arith.constant dense<0.000000e+00> : vector<4x24xf32>
    %98 = tpu.matmul %96, %97, %cst_102 {dimension_numbers = #tpu.dot_dimension_numbers<[1], [0], [0], [1], [0, 0, 1, 1], [], []>} : vector<4x4xf32>, vector<4x24xf32>, vector<4x24xf32> -> vector<4x24xf32>
    %99 = arith.addf %94, %98 : vector<4x24xf32>
    %c7_103 = arith.constant 7 : index
    %c0_104 = arith.constant 0 : index
    %c0_105 = arith.constant 0 : index
    %100 = vector.load %arg4[%c7_103, %c0_104, %c0_105] : memref<9x4x4xf32, #tpu.memory_space<vmem>>, vector<1x4x4xf32>
    %101 = vector.shape_cast %100 : vector<1x4x4xf32> to vector<4x4xf32>
    %c0_106 = arith.constant 0 : index
    %c13_107 = arith.constant 13 : index
    %102 = vector.load %arg9[%c0_106, %c13_107] : memref<4x42xf32, #tpu.memory_space<vmem>>, vector<4x24xf32>
    %cst_108 = arith.constant dense<0.000000e+00> : vector<4x24xf32>
    %103 = tpu.matmul %101, %102, %cst_108 {dimension_numbers = #tpu.dot_dimension_numbers<[1], [0], [0], [1], [0, 0, 1, 1], [], []>} : vector<4x4xf32>, vector<4x24xf32>, vector<4x24xf32> -> vector<4x24xf32>
    %104 = arith.addf %99, %103 : vector<4x24xf32>
    %c8_109 = arith.constant 8 : index
    %c0_110 = arith.constant 0 : index
    %c0_111 = arith.constant 0 : index
    %105 = vector.load %arg4[%c8_109, %c0_110, %c0_111] : memref<9x4x4xf32, #tpu.memory_space<vmem>>, vector<1x4x4xf32>
    %106 = vector.shape_cast %105 : vector<1x4x4xf32> to vector<4x4xf32>
    %c0_112 = arith.constant 0 : index
    %c14_113 = arith.constant 14 : index
    %107 = vector.load %arg9[%c0_112, %c14_113] : memref<4x42xf32, #tpu.memory_space<vmem>>, vector<4x24xf32>
    %cst_114 = arith.constant dense<0.000000e+00> : vector<4x24xf32>
    %108 = tpu.matmul %106, %107, %cst_114 {dimension_numbers = #tpu.dot_dimension_numbers<[1], [0], [0], [1], [0, 0, 1, 1], [], []>} : vector<4x4xf32>, vector<4x24xf32>, vector<4x24xf32> -> vector<4x24xf32>
    %109 = arith.addf %104, %108 : vector<4x24xf32>
    %c0_115 = arith.constant 0 : index
    %c0_116 = arith.constant 0 : index
    %110 = vector.load %arg7[%c0_115, %c0_116] : memref<24x256xf32, #tpu.memory_space<vmem>>, vector<24x256xf32>
    %cst_117 = arith.constant dense<0.000000e+00> : vector<4x256xf32>
    %111 = tpu.matmul %109, %110, %cst_117 {dimension_numbers = #tpu.dot_dimension_numbers<[1], [0], [0], [1], [0, 0, 1, 1], [], []>} : vector<4x24xf32>, vector<24x256xf32>, vector<4x256xf32> -> vector<4x256xf32>
    %c0_118 = arith.constant 0 : index
    %c0_119 = arith.constant 0 : index
    %112 = vector.load %arg5[%c0_118, %c0_119] : memref<4x1xf32, #tpu.memory_space<vmem>>, vector<4x1xf32>
    %113 = vector.broadcast %112 : vector<4x1xf32> to vector<4x256xf32>
    %114 = arith.addf %111, %113 : vector<4x256xf32>
    %c0_120 = arith.constant 0 : index
    %c0_121 = arith.constant 0 : index
    %c0_122 = arith.constant 0 : index
    %115 = vector.load %arg8[%c0_120, %c0_121, %c0_122] : memref<1x4x256xf32, #tpu.memory_space<vmem>>, vector<1x4x256xf32>
    %116 = vector.shape_cast %115 : vector<1x4x256xf32> to vector<4x256xf32>
    %117 = vector.shape_cast %114 : vector<4x256xf32> to vector<1x4x256xf32>
    tpu.vector_store %arg8[%c0_120, %c0_121, %c0_122], %117 {strides = array<i32>} : memref<1x4x256xf32, #tpu.memory_space<vmem>>, vector<1x4x256xf32>,
    return
  }
  func.func @transform_0(%arg0: i32) -> (i32, i32, i32) {
    %c0_i32 = arith.constant 0 : i32
    %c0_i32_0 = arith.constant 0 : i32
    %c0_i32_1 = arith.constant 0 : i32
    return %arg0, %c0_i32, %c0_i32_0 : i32, i32, i32
  }
  func.func @transform_1(%arg0: i32) -> (i32, i32, i32) {
    %c0_i32 = arith.constant 0 : i32
    %c0_i32_0 = arith.constant 0 : i32
    %c0_i32_1 = arith.constant 0 : i32
    %c0_i32_2 = arith.constant 0 : i32
    return %c0_i32, %c0_i32_0, %c0_i32_1 : i32, i32, i32
  }
  func.func @transform_2(%arg0: i32) -> (i32, i32) {
    %c0_i32 = arith.constant 0 : i32
    %c0_i32_0 = arith.constant 0 : i32
    %c0_i32_1 = arith.constant 0 : i32
    return %c0_i32, %c0_i32_0 : i32, i32
  }
  func.func @transform_3(%arg0: i32) -> (i32, i32, i32) {
    %c0_i32 = arith.constant 0 : i32
    %c0_i32_0 = arith.constant 0 : i32
    %c0_i32_1 = arith.constant 0 : i32
    %c0_i32_2 = arith.constant 0 : i32
    return %c0_i32, %c0_i32_0, %c0_i32_1 : i32, i32, i32
  }
  func.func @transform_4(%arg0: i32) -> (i32, i32) {
    %c0_i32 = arith.constant 0 : i32
    %c0_i32_0 = arith.constant 0 : i32
    %c0_i32_1 = arith.constant 0 : i32
    return %c0_i32, %c0_i32_0 : i32, i32
  }
  func.func @transform_5(%arg0: i32) -> (i32, i32) {
    %c0_i32 = arith.constant 0 : i32
    %c0_i32_0 = arith.constant 0 : i32
    %c0_i32_1 = arith.constant 0 : i32
    return %c0_i32, %c0_i32_0 : i32, i32
  }
  func.func @transform_6(%arg0: i32) -> (i32, i32) {
    %c0_i32 = arith.constant 0 : i32
    %c0_i32_0 = arith.constant 0 : i32
    %c0_i32_1 = arith.constant 0 : i32
    return %c0_i32, %c0_i32_0 : i32, i32
  }
  func.func @transform_7(%arg0: i32) -> (i32, i32, i32) {
    %c0_i32 = arith.constant 0 : i32
    %c0_i32_0 = arith.constant 0 : i32
    %c0_i32_1 = arith.constant 0 : i32
    return %arg0, %c0_i32, %c0_i32_0 : i32, i32, i32
  }
}

</mosaic_0001>

<bundles_post_ra>
// kernel: tpu_custom_call.1
= control target key start
LH: loop header
LB: loop body
LE: loop exit
PB: predicated region body
PF: predicated region fallthrough
CT: control target
= control target key end

     0   :  { %12 = vsyncpa [#allocation4], 0  ;;  %s2508_s0 = inlined_call_operand.vmem [shape: f32[2,8,42], index: 0, kind: input, shape index: {}]   ;;  %s2509_s1 = inlined_call_operand.vmem [shape: f32[9,4,8], index: 1, kind: input, shape index: {}]   ;;  %s2510_s2 = inlined_call_operand.vmem [shape: f32[4,1], index: 2, kind: input, shape index: {}]   ;;  %s2511_s3 = inlined_call_operand.vmem [shape: f32[9,4,4], index: 3, kind: input, shape index: {}]   ;;  %s2512_s4 = inlined_call_operand.vmem [shape: f32[4,1], index: 4, kind: input, shape index: {}]   ;;  %s2513_s5 = inlined_call_operand.vmem [shape: f32[1,24], index: 5, kind: input, shape index: {}]   ;;  %s2514_s6 = inlined_call_operand.vmem [shape: f32[24,256], index: 6, kind: input, shape index: {}]   ;;  %s2515_s7 = inlined_call_operand.hbm [shape: f32[2,4,256], index: 7, kind: output, shape index: {}]  }
   0x1   :  { %14 = vsyncpa [#allocation4 + $0x1], 0  ;;  %s2241_s24 = smov 0   ;;  %s2243_s25 = smov 0  }
   0x2   :  { %s2245_s26 = smov 0   ;;  %s2247_s27 = smov 0  }
   0x3 LB: > { %s2262_s28 = sadd.s32 4294967295, %s2186_s27   ;;  %s1890_s29 = sadd.s32 4294967294, %s2186_s27   ;;  %s2186_s27 = sphi %s2247_s27, %s2521_s27   ;;  %s2182_s26 = sphi %s2245_s26, %s2520_s26   ;;  %s2178_s25 = sphi %s2243_s25, %s2519_s25   ;;  %s2174_s24 = sphi %s2241_s24, %s2518_s24  }
   0x4   : > { %s2266_s30 = sadd.s32 1, %s2186_s27   ;;  %s179_s8 = sadd.s32 1, %s2182_s26 }
   0x5   : > { %s176_s9 = ssub.s32 %s2186_s27, %s2266_s30  ;;  %p189_p0 = scmp.ne.s32.totalorder %s2182_s26, %s2178_s25 }
   0x6   : > { %p177_p1 = scmp.eq.s32.totalorder %s176_s9, 0  ;;  %p190_p2 = scmp.eq.s32.totalorder %s2262_s28, 1 }
   0x7   : > { %p195_p3 = scmp.ne.s32.totalorder %s2178_s25, %s2174_s24  ;;  %p196_p4 = scmp.eq.s32.totalorder %s1890_s29, 1 }
   0x8   : > { %s2277_s10 = scalar_select %p177_p1, %s2182_s26, %s179_s8  }
   0x9   : > { %p2279_p5 = por %p190_p2, %p189_p0  ;;  %p2283_p6 = por %p196_p4, %p195_p3 }
   0xa   : > { %p1893_p7 = scmp.ge.s32.totalorder %s2186_s27, 1  ;;  %p239_p8 = scmp.lt.s32.totalorder %s2186_s27, 3 }
   0xc   : > { %p240_p9 = pnand %p1893_p7, %p239_p8 }
   0xd   : > { %p270_p10 = scmp.lt.s32.totalorder (!%p240_p9), %s2262_s28, 1  ;;  %s2190_s18 = smov (!%p240_p9), 127  }
   0xe   : > { %243 = sbr.rel (%p240_p9) target bundleno = 1019 (0x3fb), region = 48  ;;  %s2191_s19 = smov (!%p240_p9), 122  }
   0xf   : > { %s2192_s20 = smov (!%p240_p9), 126   ;;  %s2193_s21 = smov (!%p240_p9), 121  }
  0x10   : > { %s2195_s22 = smov (!%p240_p9), 116   ;;  %s2196_s23 = smov (!%p240_p9), 120  }
  0x11   : > { %s2197_s29 = smov (!%p240_p9), 114   ;;  %s2198_s8 = smov (!%p240_p9), 115  }
  0x12   : > { %s2199_s16 = smov (!%p240_p9), 7  }
  0x13   : > { %v2188_v0 = vmov 0.0   ;;  %vm2189_vm0 = vmmov 0   ;;  %s271_s13 = scalar_select %p270_p10, %s2262_s28, 1  ;;  %v2194_v2 = vmov 0   ;;  %v984_v3 = vld [vmem:[%s2510_s2] sm:$0xf] }
  0x14   : > { %1983 = vmatprep.subr.mxu1 %v2188_v0  ;;  %1985 = vmatprep.mubr.msk.f32.mxu1 %vm2189_vm0, %v2188_v0  ;;  %v1896_v4 = vld [vmem:[%s2509_s1 + $0x4] sm:$0xf]  ;;  %vm282_vm1 = vcmask 64512   ;;  %v274_v7 = vld [vmem:[%s2509_s1] sm:$0xf]  ;;  %vm982_vm2 = vcmask 338944  }
  0x15   : > { %1993 = vmatprep.subr.mxu0 %v2188_v0  ;;  %1995 = vmatprep.mubr.msk.f32.mxu0 %vm2189_vm0, %v2188_v0  ;;  %s1895_s14 = sshll.u32 %s271_s13, 3  ;;  %v1899_v8 = vld [vmem:[%s2509_s1 + $0x8] sm:$0xf]  ;;  %v1901_v11 = vld [vmem:[%s2509_s1 + $0xc] sm:$0xf]  ;;  %vm1003_vm3 = vcmask 248888  }
  0x16   : > { %s273_s17 = scalar_lea.vmem %s2508_s0, %s1895_s14  ;;  %2124 = vset.pattern.permute.xlu0 %v2194_v2  ;;  %2125 = vset.pattern.permute.xlu1 %v2194_v2  ;;  %v1903_v12 = vld [vmem:[%s2509_s1 + $0x10] sm:$0xf]  ;;  %v1905_v15 = vld [vmem:[%s2509_s1 + $0x14] sm:$0xf]  ;;  %v1907_v16 = vld [vmem:[%s2509_s1 + $0x18] sm:$0xf] }
  0x17   : > { %v275_v1 = vld [vmem:[%s273_s17] sm:$0xff]  ;;  %v1909_v19 = vld [vmem:[%s2509_s1 + $0x1c] sm:$0xf]  ;;  %983 = vst.msk [vmem:[#allocation2] sm:$0xf] %vm982_vm2, %v2188_v0  ;;  %vm1016_vm4 = vcmask 1043456  }
  0x18   : > { %279 = vrot.lane.b32.xlu0 %v275_v1, %s2190_s18  ;;  %510 = vrot.lane.b32.xlu1 %v275_v1, %s2191_s19  ;;  %v1911_v20 = vld [vmem:[%s2509_s1 + $0x20] sm:$0xf]  ;;  %vm1012_vm5 = vcmask 31744   ;;  %v1914_v54 = vld [vmem:[%s2511_s3 + $0x4] sm:$0xf]  ;;  %vm1736_vm6 = vcmask 195584  }
  0x19   : > { %v1913_v48 = vld [vmem:[%s2513_s5] ss:$0 sm:$0xff]  ;;  %v1919_v57 = vld [vmem:[%s2511_s3 + $0x8] sm:$0xf]  ;;  %v1922_v58 = vld [vmem:[%s2511_s3 + $0xc] sm:$0xf] }
  0x1a   : > { %v1005_v53 = vld [vmem:[%s2511_s3] sm:$0xf]  ;;  %v1925_v61 = vld [vmem:[%s2511_s3 + $0x10] sm:$0xf]  ;;  %v1928_v62 = vld [vmem:[%s2511_s3 + $0x14] sm:$0xf] }
  0x1b   : > { %v1931_v2 = vld [vmem:[%s2511_s3 + $0x18] sm:$0xf]  ;;  %s2200_s17 = smov [#allocation3]  }
  0x1c   : > { %431 = vrot.lane.b32.xlu0 %v275_v1, %s2192_s20  ;;  %589 = vrot.lane.b32.xlu1 %v275_v1, %s2193_s21  ;;  %s2130_s9 = sshll.u32 %s2200_s17, 4  ;;  %s2131_s9 = int_to_ptr.vmem [resolvable:$false] %s2130_s9 }
  0x20   : > { %747 = vrot.lane.b32.xlu1 %v275_v1, %s2195_s22  ;;  %668 = vrot.lane.b32.xlu0 %v275_v1, %s2196_s23 }
  0x24   : > { %905 = vrot.lane.b32.xlu1 %v275_v1, %s2197_s29  ;;  %826 = vrot.lane.b32.xlu0 %v275_v1, %s2198_s8 }
  0x28   : > { %987 = vperm.xlu0 %2124, %v984_v3   ;;  %v1934_v3 = vld [vmem:[%s2511_s3 + $0x1c] sm:$0xf] }
  0x8a   : > { %v280_v5 = vpop.permute.xlu0 %279  ;;  %v511_v6 = vpop.permute.xlu1 %510 }
  0x8b   : > { %1984 = vmatpush3.msra.mxu1 %v280_v5 }
  0x8c   : > { %1986 = vmatmul.mubr.msk.f32.vlgmr.msra.gmra.mxu1 %vm282_vm1, %v1896_v4  ;;  %1988 = vmatprep.subr.mxu1 %v2188_v0 }
  0x8d   : > { %1989 = vmatpush3.msra.mxu1 %v275_v1  ;;  %1990 = vmatprep.mubr.msk.f32.mxu1 %vm2189_vm0, %v2188_v0 }
  0x8e   : > { %v432_v9 = vpop.permute.xlu0 %431  ;;  %1998 = vmatprep.subr.mxu1 %v2188_v0  ;;  %v590_v10 = vpop.permute.xlu1 %589 }
  0x8f   : > { %1994 = vmatpush3.msra.mxu0 %v432_v9  ;;  %v1728_v9 = vld [vmem:[%s2514_s6 + $0x20] sm:$0xff] }
  0x90   : > { %1991 = vmatmul.mubr.msk.f32.vlgmr.msra.gmra.mxu1 %vm282_vm1, %v274_v7  ;;  %1996 = vmatmul.mubr.msk.f32.vlgmr.msra.gmra.mxu0 %vm282_vm1, %v1899_v8  ;;  %v1729_v7 = vld [vmem:[%s2514_s6 + $0x28] sm:$0xff] }
  0x91   : > { %1999 = vmatpush3.msra.mxu1 %v511_v6  ;;  %2003 = vmatprep.subr.mxu0 %v2188_v0  ;;  %v1937_v6 = vld [vmem:[%s2511_s3 + $0x20] sm:$0xf] }
  0x92   : > { %2000 = vmatprep.mubr.msk.f32.mxu1 %vm2189_vm0, %v2188_v0  ;;  %2004 = vmatpush3.msra.mxu0 %v590_v10  ;;  %v748_v13 = vpop.permute.xlu1 %747  ;;  %v669_v14 = vpop.permute.xlu0 %668  ;;  %v1727_v10 = vld [vmem:[%s2514_s6 + $0x18] sm:$0xff] }
  0x93   : > { %2005 = vmatprep.mubr.msk.f32.mxu0 %vm2189_vm0, %v2188_v0  ;;  %2008 = vmatprep.subr.mxu1 %v2188_v0 }
  0x94   : > { %2001 = vmatmul.mubr.msk.f32.vlgmr.msra.gmra.mxu1 %vm282_vm1, %v1901_v11  ;;  %2006 = vmatmul.mubr.msk.f32.vlgmr.msra.gmra.mxu0 %vm282_vm1, %v1903_v12  ;;  %v1725_v12 = vld [vmem:[%s2514_s6 + $0x8] sm:$0xff] }
  0x95   : > { %2013 = vmatprep.subr.mxu0 %v2188_v0  ;;  %2009 = vmatpush3.msra.mxu1 %v669_v14  ;;  %v1730_v14 = vld [vmem:[%s2512_s4] sm:$0xf] }
  0x96   : > { %2010 = vmatprep.mubr.msk.f32.mxu1 %vm2189_vm0, %v2188_v0  ;;  %2014 = vmatpush3.msra.mxu0 %v748_v13  ;;  %v827_v17 = vpop.permute.xlu0 %826  ;;  %v906_v18 = vpop.permute.xlu1 %905  ;;  %v1724_v13 = vld [vmem:[%s2514_s6] sm:$0xff] }
  0x97   : > { %2015 = vmatprep.mubr.msk.f32.mxu0 %vm2189_vm0, %v2188_v0  ;;  %2018 = vmatprep.subr.mxu1 %v2188_v0 }
  0x98   : > { %2011 = vmatmul.mubr.msk.f32.vlgmr.msra.gmra.mxu1 %vm282_vm1, %v1905_v15  ;;  %2016 = vmatmul.mubr.msk.f32.vlgmr.msra.gmra.mxu0 %vm282_vm1, %v1907_v16 }
  0x99   : > { %2023 = vmatprep.subr.mxu0 %v2188_v0  ;;  %2019 = vmatpush3.msra.mxu1 %v827_v17 }
  0x9a   : > { %2020 = vmatprep.mubr.msk.f32.mxu1 %vm2189_vm0, %v2188_v0  ;;  %2024 = vmatpush3.msra.mxu0 %v906_v18 }
  0x9b   : > { %2025 = vmatprep.mubr.msk.f32.mxu0 %vm2189_vm0, %v2188_v0  ;;  %2033 = vmatprep.subr.mxu0 %v2188_v0 }
  0x9c   : > { %2021 = vmatmul.mubr.msk.f32.vlgmr.msra.gmra.mxu1 %vm282_vm1, %v1909_v19  ;;  %2026 = vmatmul.mubr.msk.f32.vlgmr.msra.gmra.mxu0 %vm282_vm1, %v1911_v20 }
  0x9d   : > { %2028 = vmatprep.subr.mxu1 %v2188_v0  ;;  %2030 = vmatprep.mubr.msk.f32.mxu1 %vm2189_vm0, %v2188_v0 }
  0x9e   : > { %2035 = vmatprep.mubr.msk.f32.mxu0 %vm2189_vm0, %v2188_v0 }
  0xa3   : > { %v988_v44 = vpop.permute.xlu0 %987 }
 0x14c   : > { %v352_v21 = vpop.f32.mrf.mxu1 }
 0x14e   : > { %v1987_v22 = vpop.f32.mrf.mxu1 }
 0x150   : > { %v425_v23 = vpop.f32.mrf.mxu1  ;;  %v503_v24 = vpop.f32.mrf.mxu0 }
 0x151   : > { %v426_v25 = vadd.f32 %v425_v23, %v352_v21 }
 0x152   : > { %v1992_v26 = vpop.f32.mrf.mxu1  ;;  %v1997_v27 = vpop.f32.mrf.mxu0 }
 0x153   : > { %v507_v28 = vadd.f32 %v503_v24, %v426_v25 }
 0x154   : > { %v582_v29 = vpop.f32.mrf.mxu1  ;;  %v661_v30 = vpop.f32.mrf.mxu0 }
 0x155   : > { %v586_v31 = vadd.f32 %v582_v29, %v507_v28 }
 0x156   : > { %v2002_v32 = vpop.f32.mrf.mxu1  ;;  %v2007_v33 = vpop.f32.mrf.mxu0 }
 0x157   : > { %v665_v34 = vadd.f32 %v661_v30, %v586_v31 }
 0x158   : > { %v740_v35 = vpop.f32.mrf.mxu1  ;;  %v819_v36 = vpop.f32.mrf.mxu0 }
 0x159   : > { %v744_v37 = vadd.f32 %v740_v35, %v665_v34 }
 0x15a   : > { %v2012_v38 = vpop.f32.mrf.mxu1  ;;  %v2017_v39 = vpop.f32.mrf.mxu0 }
 0x15b   : > { %v823_v40 = vadd.f32 %v819_v36, %v744_v37 }
 0x15c   : > { %v898_v41 = vpop.f32.mrf.mxu1  ;;  %v977_v42 = vpop.f32.mrf.mxu0 }
 0x15d   : > { %v902_v43 = vadd.f32 %v898_v41, %v823_v40 }
 0x15e   : > { %v2022_v45 = vpop.f32.mrf.mxu1  ;;  %v2027_v46 = vpop.f32.mrf.mxu0 }
 0x15f   : > { %v981_v47 = vadd.f32 %v977_v42, %v902_v43 }
 0x161   : > { %v990_v49 = vadd.f32 %v988_v44, %v981_v47 }
 0x163   : > { %v998_v50 = vmul.f32 %v1913_v48, %v990_v49 }
 0x165   : > { %1000 = vrot.lane.b32.xlu1 %v998_v50, %s2199_s16 }
 0x1d7   : > { %v1001_v51 = vpop.permute.xlu1 %1000 }
 0x1d8   : > { %1004 = vst.msk [vmem:[#allocation2] sm:$0xf] %vm1003_vm3, %v1001_v51 }
 0x1df   : > { %v1006_v52 = vld [vmem:[#allocation2] sm:$0xf] }
 0x1e0   : > { %1166 = vrot.lane.b32.xlu0 %v1006_v52, %s2192_s20  ;;  %1010 = vrot.lane.b32.xlu1 %v1006_v52, %s2190_s18 }
 0x1e1   : > { %2034 = vmatpush3.msk.msra.mxu0 %vm1016_vm4, %v1006_v52 }
 0x1e2   : > { %2036 = vmatmul.mubr.msk.f32.vlgmr.msra.gmra.mxu0 %vm1012_vm5, %v1005_v53  ;;  %2043 = vmatprep.subr.mxu0 %v2188_v0 }
 0x1e3   : > { %2045 = vmatprep.mubr.msk.f32.mxu0 %vm2189_vm0, %v2188_v0 }
 0x1e4   : > { %1326 = vrot.lane.b32.xlu0 %v1006_v52, %s2193_s21  ;;  %1246 = vrot.lane.b32.xlu1 %v1006_v52, %s2191_s19  ;;  %s267_s19 = sand.u32 1, %s2178_s25  }
 0x1e5   : > { %s1894_s21 = sshll.u32 %s267_s19, 3  ;;  %s1817_s15 = scalar_lea.sflag [#allocation4], %s267_s19 }
 0x1e8   : > { %1486 = vrot.lane.b32.xlu0 %v1006_v52, %s2195_s22  ;;  %1406 = vrot.lane.b32.xlu1 %v1006_v52, %s2196_s23  ;;  %s1946_s22 = sshll.u32 %s2262_s28, 7  ;;  %s269_s23 = scalar_lea.vmem [#allocation3], %s1894_s21 }
 0x1e9   : > { %s1829_s14 = scalar_lea.hbm %s2515_s7, %s1946_s22  ;;  %s2132_s28 = scalar_lea.vmem %s2131_s9, 256 }
 0x1ec   : > { %1646 = vrot.lane.b32.xlu0 %v1006_v52, %s2197_s29  ;;  %1566 = vrot.lane.b32.xlu1 %v1006_v52, %s2198_s8  ;;  %s1831_s29 = sshll.u32 %s269_s23, 4  ;;  %s1832_s29 = int_to_ptr.vmem [resolvable:$true] %s1831_s29 }
 0x1ed   : > { %s2126_s16 = scalar_lea.vmem %s1832_s29, 128  ;;  %p2133_p0 = scmp.lt.s32.totalorder %s1832_s29, %s2131_s9 }
 0x1ee   : > { %p2127_p11 = scmp.ne.s32.totalorder %s1832_s29, %s2126_s16  ;;  %p2134_p1 = scmp.lt.s32.totalorder %s2132_s28, %s2126_s16 }
 0x1f0   : > { %1733 = vperm.xlu1 %2125, %v1730_v14   ;;  %p2128_p12 = pnand %p2127_p11, %p2279_p5  ;;  %p2135_p2 = por %p2134_p1, %p2133_p0 }
 0x1f2   : > { %p2129_p13 = pneg %p2128_p12 }
 0x1f4   : > { %p2136_p3 = pnand %p2135_p2, %p2129_p13 }
 0x252   : > { %v1167_v55 = vpop.permute.xlu0 %1166  ;;  %v1011_v56 = vpop.permute.xlu1 %1010 }
 0x253   : > { %2029 = vmatpush3.msk.msra.mxu1 %vm1016_vm4, %v1011_v56 }
 0x254   : > { %2031 = vmatmul.mubr.msk.f32.vlgmr.msra.gmra.mxu1 %vm1012_vm5, %v1914_v54  ;;  %2038 = vmatprep.subr.mxu1 %v2188_v0 }
 0x255   : > { %2039 = vmatpush3.msk.msra.mxu1 %vm1016_vm4, %v1167_v55  ;;  %2040 = vmatprep.mubr.msk.f32.mxu1 %vm2189_vm0, %v2188_v0 }
 0x256   : > { %v1327_v59 = vpop.permute.xlu0 %1326  ;;  %v1247_v60 = vpop.permute.xlu1 %1246  ;;  %2048 = vmatprep.subr.mxu1 %v2188_v0 }
 0x257   : > { %2044 = vmatpush3.msk.msra.mxu0 %vm1016_vm4, %v1247_v60 }
 0x258   : > { %2041 = vmatmul.mubr.msk.f32.vlgmr.msra.gmra.mxu1 %vm1012_vm5, %v1919_v57  ;;  %2046 = vmatmul.mubr.msk.f32.vlgmr.msra.gmra.mxu0 %vm1012_vm5, %v1922_v58 }
 0x259   : > { %2049 = vmatpush3.msk.msra.mxu1 %vm1016_vm4, %v1327_v59  ;;  %2053 = vmatprep.subr.mxu0 %v2188_v0 }
 0x25a   : > { %v1487_v63 = vpop.permute.xlu0 %1486  ;;  %v1407_v1 = vpop.permute.xlu1 %1406  ;;  %2050 = vmatprep.mubr.msk.f32.mxu1 %vm2189_vm0, %v2188_v0  ;;  %2058 = vmatprep.subr.mxu1 %v2188_v0 }
 0x25b   : > { %2054 = vmatpush3.msk.msra.mxu0 %vm1016_vm4, %v1407_v1  ;;  %2055 = vmatprep.mubr.msk.f32.mxu0 %vm2189_vm0, %v2188_v0 }
 0x25c   : > { %2051 = vmatmul.mubr.msk.f32.vlgmr.msra.gmra.mxu1 %vm1012_vm5, %v1925_v61  ;;  %2056 = vmatmul.mubr.msk.f32.vlgmr.msra.gmra.mxu0 %vm1012_vm5, %v1928_v62 }
 0x25d   : > { %2059 = vmatpush3.msk.msra.mxu1 %vm1016_vm4, %v1487_v63  ;;  %2063 = vmatprep.subr.mxu0 %v2188_v0 }
 0x25e   : > { %v1647_v4 = vpop.permute.xlu0 %1646  ;;  %v1567_v5 = vpop.permute.xlu1 %1566  ;;  %2060 = vmatprep.mubr.msk.f32.mxu1 %vm2189_vm0, %v2188_v0  ;;  %2068 = vmatprep.subr.mxu1 %v2188_v0 }
 0x25f   : > { %2064 = vmatpush3.msk.msra.mxu0 %vm1016_vm4, %v1567_v5  ;;  %2065 = vmatprep.mubr.msk.f32.mxu0 %vm2189_vm0, %v2188_v0 }
 0x260   : > { %2061 = vmatmul.mubr.msk.f32.vlgmr.msra.gmra.mxu1 %vm1012_vm5, %v1931_v2  ;;  %2066 = vmatmul.mubr.msk.f32.vlgmr.msra.gmra.mxu0 %vm1012_vm5, %v1934_v3 }
 0x261   : > { %2069 = vmatpush3.msk.msra.mxu1 %vm1016_vm4, %v1647_v4  ;;  %2070 = vmatprep.mubr.msk.f32.mxu1 %vm2189_vm0, %v2188_v0 }
 0x262   : > { %1804 = vmatprep.mubr.f32.mxu0 %v2188_v0  ;;  %1766 = vmatprep.subr.mxu0 %v1729_v7  ;;  %v1726_v0 = vld [vmem:[%s2514_s6 + $0x10] sm:$0xff] }
 0x263   : > { %1767 = vmatpush1.msra.mxu0 %v1728_v9 }
 0x264   : > { %2071 = vmatmul.mubr.msk.f32.vlgmr.msra.gmra.mxu1 %vm1012_vm5, %v1937_v6  ;;  %1768 = vmatprep.subr.mxu0 %v1727_v10 }
 0x265   : > { %1769 = vmatpush1.msra.mxu0 %v1726_v0 }
 0x266   : > { %1770 = vmatprep.subr.mxu0 %v1725_v12 }
 0x267   : > { %1771 = vmatpush1.msra.mxu0 %v1724_v13 }
 0x26b   : > { %v1734_v40 = vpop.permute.xlu1 %1733 }
 0x2a2   : > { %v1160_v8 = vpop.f32.mrf.mxu0 }
 0x2a4   : > { %v2037_v11 = vpop.f32.mrf.mxu0 }
 0x314   : > { %v1085_v15 = vpop.f32.mrf.mxu1 }
 0x315   : > { %v1161_v17 = vadd.f32 %v1160_v8, %v1085_v15 }
 0x316   : > { %v2032_v16 = vpop.f32.mrf.mxu1 }
 0x318   : > { %v1239_v18 = vpop.f32.mrf.mxu1  ;;  %v1319_v19 = vpop.f32.mrf.mxu0 }
 0x319   : > { %v1243_v20 = vadd.f32 %v1239_v18, %v1161_v17 }
 0x31a   : > { %v2042_v21 = vpop.f32.mrf.mxu1  ;;  %v2047_v22 = vpop.f32.mrf.mxu0 }
 0x31b   : > { %v1323_v23 = vadd.f32 %v1319_v19, %v1243_v20 }
 0x31c   : > { %v1399_v24 = vpop.f32.mrf.mxu1  ;;  %v1479_v25 = vpop.f32.mrf.mxu0 }
 0x31d   : > { %v1403_v26 = vadd.f32 %v1399_v24, %v1323_v23 }
 0x31e   : > { %v2052_v27 = vpop.f32.mrf.mxu1  ;;  %v2057_v28 = vpop.f32.mrf.mxu0 }
 0x31f   : > { %v1483_v29 = vadd.f32 %v1479_v25, %v1403_v26 }
 0x320   : > { %v1559_v30 = vpop.f32.mrf.mxu1  ;;  %v1639_v31 = vpop.f32.mrf.mxu0 }
 0x321   : > { %v1563_v32 = vadd.f32 %v1559_v30, %v1483_v29 }
 0x322   : > { %v2062_v33 = vpop.f32.mrf.mxu1  ;;  %v2067_v34 = vpop.f32.mrf.mxu0 }
 0x323   : > { %v1643_v35 = vadd.f32 %v1639_v31, %v1563_v32 }
 0x324   : > { %v1719_v36 = vpop.f32.mrf.mxu1 }
 0x325   : > { %v1723_v37 = vadd.f32 %v1719_v36, %v1643_v35 }
 0x326   : > { %v2072_v38 = vpop.f32.mrf.mxu1 }
 0x327   : > { %1940 = vmatmul.mubr.msk.f32.vlgmr.msra.gmra.mxu0 %vm1736_vm6, %v1723_v37 }
 0x3e7   : > { %v1806_v39 = vpop.f32.mrf.mxu0 }
 0x3e8   : > { %v1807_v42 = vadd.f32 %v1806_v39, %v1734_v40 }
 0x3e9   : > { %v1808_v41 = vpop.f32.mrf.mxu0 }
 0x3ea   : > { %v1809_v43 = vadd.f32 %v1808_v41, %v1734_v40 }
 0x3ec   : > { %v1813_v44 = vcombine.low %v1807_v42, %v1809_v43 }
 0x3ee   : > { %1815 = vst [vmem:[%s269_s23] sm:$0xff] %v1813_v44 }
 0x3ef   : > { %2139 = shalt.err (!%p2136_p3)
}
 0x3f0   : > { %s2140_s18 = scalar_lea.hbm %s1829_s14, 128  ;;  %s2144_s21 = scalar_lea.hbm %s2515_s7, 256 }
 0x3f1   : > { %p2141_p4 = scmp.ne.s32.totalorder %s1829_s14, %s2140_s18  ;;  %p2145_p9 = scmp.lt.s32.totalorder %s1829_s14, %s2515_s7 }
 0x3f2   : > { %p2146_p10 = scmp.lt.s32.totalorder %s2144_s21, %s2140_s18 }
 0x3f3   : > { %p2142_p7 = pnand %p2141_p4, %p2279_p5 }
 0x3f4   : > { %p2147_p11 = por %p2146_p10, %p2145_p9 }
 0x3f5   : > { %p2143_p8 = pneg %p2142_p7 }
 0x3f7   : > { %p2148_p12 = pnand %p2147_p11, %p2143_p8 }
 0x3f9   : > { %2151 = shalt.err (!%p2148_p12)
}
 0x3fa   : > { %2073 = dma.vmem_to_hbm [thread:$0]  (%p2279_p5), %s1832_s29, 128, %s1829_s14, %s1817_s15  }
 0x3fb PF: > { %p2079_p13 = scmp.ge.s32.totalorder %s2186_s27, 2  ;;  %s1843_s8 = sand.u32 1, %s2174_s24  }
 0x3fc   : > { %s1844_s13 = scalar_lea.sflag [#allocation4], %s1843_s8 }
 0x3fd   : > { %p2076_p0 = pnand %p2079_p13, %p2283_p6 }
 0x3ff   : > { %p2077_p1 = pneg %p2076_p0 }
 0x401   : > { %2169 = dma.done.wait (%p2077_p1), %s1844_s13, 128  }
 0x402   : > { %2171 = vsyncadd (%p2077_p1), %s1844_s13, 4294967168  ;;  %p17_p2 = scmp.ge.s32.totalorder %s2266_s30, 4   ;;  %s2518_s24 = smov %s2178_s25 }
 0x403   : > { %s2519_s25 = smov %s2182_s26  ;;  %s2520_s26 = smov %s2277_s10 }
 0x404   : > { %s2521_s27 = smov %s2266_s30  ;;  %19 = sbr.rel (!%p17_p2) target bundleno = 3 (0x3), region = 99 }
 0x409   :  { %1849 = vsyncpa [#allocation4], 1 }
 0x40a   :  { %1851 = vsyncpa [#allocation4 + $0x1], 1 }

</bundles_post_ra>
